<compile_context>
chip_gen: v5e
topology: v5e:2x2
jax: 0.10.0
libtpu: 0.0.40
codegen_flags: <defaults>
</compile_context>

<pallas_src>
import functools

import numpy as np
import jax
import jax.numpy as jnp
from jax.experimental import pallas as pl
from jax.experimental.pallas import tpu as pltpu


def _gem_kernel_fast(x_ref, o_ref, acc_ref, *, eps, inv_s, p_int, inv_p):
    """Uniform small-integer exponent: x**p via repeated VPU multiplies."""
    sb = pl.program_id(2)

    @pl.when(sb == 0)
    def _():
        acc_ref[...] = jnp.zeros_like(acc_ref)

    x = x_ref[...].astype(jnp.float32)            # (C_tile, S_tile)
    xc = jnp.maximum(x, eps)                      # clamp(min=eps)
    xp = xc
    for _ in range(p_int - 1):                    # x ** p, integer p (VPU only)
        xp = xp * xc
    acc_ref[...] += jnp.sum(xp, axis=1, keepdims=True)   # (C_tile, 1)

    @pl.when(sb == pl.num_programs(2) - 1)
    def _():
        m = acc_ref[...] * inv_s                  # spatial mean
        out = jnp.exp(jnp.log(m) * inv_p)         # m ** (1/p); m >= eps**p > 0
        o_ref[...] = out.astype(o_ref.dtype)      # (C_tile, 1)


def _gem_kernel_general(p_ref, invp_ref, x_ref, o_ref, acc_ref, *, eps, inv_s):
    """Per-channel float exponent: x**p = exp(p * log(x))."""
    sb = pl.program_id(2)

    @pl.when(sb == 0)
    def _():
        acc_ref[...] = jnp.zeros_like(acc_ref)

    x = x_ref[...].astype(jnp.float32)            # (C_tile, S_tile)
    p = p_ref[...]                                # (C_tile, 1) broadcasts over S
    xc = jnp.maximum(x, eps)
    xp = jnp.exp(p * jnp.log(xc))
    acc_ref[...] += jnp.sum(xp, axis=1, keepdims=True)   # (C_tile, 1)

    @pl.when(sb == pl.num_programs(2) - 1)
    def _():
        m = acc_ref[...] * inv_s
        out = jnp.exp(jnp.log(m) * invp_ref[...])
        o_ref[...] = out.astype(o_ref.dtype)


def _pick_tile(full, base, cap):
    """Largest multiple of `base` dividing `full` and <= cap; else `full`.

    A full-extent block is always legal w.r.t. the (8, 128) tiling rule.
    """
    if full % base != 0:
        return full
    best = base
    t = base
    limit = min(full, cap)
    while t <= limit:
        if full % t == 0:
            best = t
        t += base
    return best


def gem_pallas(x_nchw, p, eps=1e-6, allow_fast_path=True):
    """x_nchw: (B, C, H, W); p: (C,) per-channel exponents. Returns (B, C)."""
    B, C, H, W = x_nchw.shape
    S = H * W
    # Free reshape: NCHW -> (B, C, S).  No transpose, no extra HBM pass.
    x_slab = x_nchw.reshape(B, C, S)
    itemsize = jnp.dtype(x_slab.dtype).itemsize

    # C on sublanes (multiples of 8), S on lanes (multiples of 128).  Bound the
    # double-buffered input block to ~8 MiB of VMEM (4 MiB per buffer).
    # (If S is not a multiple of 128 the whole-S fallback block is used.)
    c_tile = _pick_tile(C, 8, 256)
    s_budget = max(128, (4 * 1024 * 1024) // (itemsize * c_tile))
    s_tile = _pick_tile(S, 128, s_budget)

    grid = (B, C // c_tile, S // s_tile)
    inv_s = 1.0 / float(S)

    # Detect the common "uniform small-integer exponent" case at trace time.
    p_int = None
    if allow_fast_path:
        try:
            p_host = np.asarray(p)
            p0 = float(p_host.reshape(-1)[0])
            if (p_host.size > 0 and np.all(p_host == p0)
                    and float(round(p0)) == p0 and 1 <= int(round(p0)) <= 16):
                p_int = int(round(p0))
        except Exception:
            p_int = None  # p is a tracer -> general per-channel path

    x_spec = pl.BlockSpec((pl.Squeezed(), c_tile, s_tile),
                          lambda b, cb, sb: (b, cb, sb))
    out_spec = pl.BlockSpec((pl.Squeezed(), c_tile, 1),
                            lambda b, cb, sb: (b, cb, 0))
    out_shape = jax.ShapeDtypeStruct((B, C, 1), x_nchw.dtype)
    scratch = [pltpu.VMEM((c_tile, 1), jnp.float32)]
    cparams = pltpu.CompilerParams(
        dimension_semantics=("parallel", "parallel", "arbitrary"))

    n = B * C * S
    io_bytes = n * itemsize + B * C * itemsize

    if p_int is not None:
        kernel = functools.partial(_gem_kernel_fast, eps=float(eps),
                                   inv_s=inv_s, p_int=p_int,
                                   inv_p=1.0 / float(p_int))
        cost = pl.CostEstimate(flops=(p_int + 1) * n,
                               transcendentals=2 * B * C,
                               bytes_accessed=io_bytes)
        out3 = pl.pallas_call(
            kernel,
            out_shape=out_shape,
            grid_spec=pltpu.PrefetchScalarGridSpec(
                num_scalar_prefetch=0,
                grid=grid,
                in_specs=[x_spec],
                out_specs=out_spec,
                scratch_shapes=scratch),
            compiler_params=cparams,
            cost_estimate=cost,
        )(x_slab)
    else:
        p_col = p.reshape(C, 1).astype(jnp.float32)
        invp_col = (1.0 / p_col).astype(jnp.float32)   # precompute 1/p once
        p_spec = pl.BlockSpec((c_tile, 1), lambda b, cb, sb: (cb, 0))
        kernel = functools.partial(_gem_kernel_general, eps=float(eps),
                                   inv_s=inv_s)
        cost = pl.CostEstimate(flops=3 * n,
                               transcendentals=2 * n + 2 * B * C,
                               bytes_accessed=io_bytes)
        out3 = pl.pallas_call(
            kernel,
            out_shape=out_shape,
            grid_spec=pltpu.PrefetchScalarGridSpec(
                num_scalar_prefetch=0,
                grid=grid,
                in_specs=[p_spec, p_spec, x_spec],
                out_specs=out_spec,
                scratch_shapes=scratch),
            compiler_params=cparams,
            cost_estimate=cost,
        )(p_col, invp_col, x_slab)

    return out3.reshape(B, C)


def gem_reference(x_nchw, p, eps=1e-6):
    """Pure-JAX reference mirroring the PyTorch forward."""
    xc = jnp.maximum(x_nchw, eps)                            # clamp(min=eps)
    xp = jnp.power(xc, p[None, :, None, None])               # per-channel pow
    m = jnp.mean(xp, axis=(2, 3))                            # full avg_pool2d
    return jnp.power(m, 1.0 / p[None, :])                    # (B, C)


if __name__ == "__main__":
    key = jax.random.PRNGKey(0)
    B, C, H, W = 2, 4, 16, 16

    x = jax.random.normal(key, (B, C, H, W), dtype=jnp.float32)
    # nn.Parameter(torch.ones(dim) * p) with the GeM default p=3
    p_uniform = jnp.ones((C,), dtype=jnp.float32) * 3.0

    # --- fast path: uniform integer exponent -> VPU multiplies ---
    ref_u = gem_reference(x, p_uniform)
    out_fast = jax.block_until_ready(gem_pallas(x, p_uniform))
    assert out_fast.shape == (B, C)
    assert jnp.allclose(out_fast, ref_u, rtol=1e-4, atol=1e-6), (out_fast, ref_u)

    # --- general path: per-channel float exponents -> exp(p * log(x)) ---
    p_varied = 2.5 + 0.25 * jnp.arange(C, dtype=jnp.float32)
    ref_v = gem_reference(x, p_varied)
    out_gen = jax.block_until_ready(gem_pallas(x, p_varied))
    assert out_gen.shape == (B, C)
    assert jnp.allclose(out_gen, ref_v, rtol=1e-4, atol=1e-6), (out_gen, ref_v)

    # also exercise the general kernel with uniform p (forced)
    out_gen_u = jax.block_until_ready(
        gem_pallas(x, p_uniform, allow_fast_path=False))
    assert jnp.allclose(out_gen_u, ref_u, rtol=1e-4, atol=1e-6)

    print("KERNEL_OK")
</pallas_src>

<mosaic_0001>
module attributes {stable_mosaic.version = 11 : i64} {
  func.func @_gem_kernel_fast(%arg0: i32, %arg1: i32, %arg2: i32, %arg3: memref<1x4x256xf32, #tpu.memory_space<vmem>>, %arg4: memref<1x4x1xf32, #tpu.memory_space<vmem>>, %arg5: memref<4x1xf32, #tpu.memory_space<vmem>>) attributes {dimension_semantics = [#tpu.dimension_semantics<parallel>, #tpu.dimension_semantics<parallel>, #tpu.dimension_semantics<arbitrary>], iteration_bounds = array<i64: 2, 1, 1>, scalar_prefetch = 0 : i64, scratch_operands = 1 : i64, tpu.core_type = #tpu.core_type<tc>, window_params = [{transform_indices = @transform_0, window_bounds = array<i64: 1, 4, 256>}, {transform_indices = @transform_1, window_bounds = array<i64: 1, 4, 1>}]} {
    %c0_i32 = arith.constant 0 : i32
    %0 = arith.cmpi eq, %arg2, %c0_i32 : i32
    %1 = arith.extui %0 : i1 to i32
    %c0_i32_0 = arith.constant 0 : i32
    %2 = arith.cmpi ne, %1, %c0_i32_0 : i32
    scf.if %2 {
      %cst_10 = arith.constant 0.000000e+00 : f32
      %17 = vector.broadcast %cst_10 : f32 to vector<4x1xf32>
      %c0_11 = arith.constant 0 : index
      %c0_12 = arith.constant 0 : index
      %18 = vector.load %arg5[%c0_11, %c0_12] : memref<4x1xf32, #tpu.memory_space<vmem>>, vector<4x1xf32>
      tpu.vector_store %arg5[%c0_11, %c0_12], %17 {strides = array<i32>} : memref<4x1xf32, #tpu.memory_space<vmem>>, vector<4x1xf32>,
    } else {
    }
    %c0 = arith.constant 0 : index
    %c0_1 = arith.constant 0 : index
    %c0_2 = arith.constant 0 : index
    %3 = vector.load %arg3[%c0, %c0_1, %c0_2] : memref<1x4x256xf32, #tpu.memory_space<vmem>>, vector<1x4x256xf32>
    %4 = vector.shape_cast %3 : vector<1x4x256xf32> to vector<4x256xf32>
    %cst = arith.constant 9.99999997E-7 : f32
    %5 = vector.broadcast %cst : f32 to vector<4x256xf32>
    %6 = arith.maximumf %4, %5 : vector<4x256xf32>
    %7 = arith.mulf %6, %6 : vector<4x256xf32>
    %8 = arith.mulf %7, %6 : vector<4x256xf32>
    %c0_3 = arith.constant 0 : index
    %c0_4 = arith.constant 0 : index
    %9 = vector.load %arg5[%c0_3, %c0_4] : memref<4x1xf32, #tpu.memory_space<vmem>>, vector<4x1xf32>
    %cst_5 = arith.constant dense<0.000000e+00> : vector<4xf32>
    %10 = vector.multi_reduction <add>, %8, %cst_5 [1] : vector<4x256xf32> to vector<4xf32>
    %11 = vector.shape_cast %10 : vector<4xf32> to vector<4x1xf32>
    %12 = arith.addf %9, %11 : vector<4x1xf32>
    %c0_6 = arith.constant 0 : index
    %c0_7 = arith.constant 0 : index
    %13 = vector.load %arg5[%c0_6, %c0_7] : memref<4x1xf32, #tpu.memory_space<vmem>>, vector<4x1xf32>
    tpu.vector_store %arg5[%c0_6, %c0_7], %12 {strides = array<i32>} : memref<4x1xf32, #tpu.memory_space<vmem>>, vector<4x1xf32>,
    %c0_i32_8 = arith.constant 0 : i32
    %14 = arith.cmpi eq, %arg2, %c0_i32_8 : i32
    %15 = arith.extui %14 : i1 to i32
    %c0_i32_9 = arith.constant 0 : i32
    %16 = arith.cmpi ne, %15, %c0_i32_9 : i32
    scf.if %16 {
      %c0_10 = arith.constant 0 : index
      %c0_11 = arith.constant 0 : index
      %17 = vector.load %arg5[%c0_10, %c0_11] : memref<4x1xf32, #tpu.memory_space<vmem>>, vector<4x1xf32>
      %cst_12 = arith.constant 3.906250e-03 : f32
      %18 = vector.broadcast %cst_12 : f32 to vector<4x1xf32>
      %19 = arith.mulf %17, %18 : vector<4x1xf32>
      %20 = math.log %19 : vector<4x1xf32>
      %cst_13 = arith.constant 0.333333343 : f32
      %21 = vector.broadcast %cst_13 : f32 to vector<4x1xf32>
      %22 = arith.mulf %20, %21 : vector<4x1xf32>
      %23 = math.exp %22 : vector<4x1xf32>
      %c0_14 = arith.constant 0 : index
      %c0_15 = arith.constant 0 : index
      %c0_16 = arith.constant 0 : index
      %24 = vector.load %arg4[%c0_14, %c0_15, %c0_16] : memref<1x4x1xf32, #tpu.memory_space<vmem>>, vector<1x4x1xf32>
      %25 = vector.shape_cast %24 : vector<1x4x1xf32> to vector<4x1xf32>
      %26 = vector.shape_cast %23 : vector<4x1xf32> to vector<1x4x1xf32>
      tpu.vector_store %arg4[%c0_14, %c0_15, %c0_16], %26 {strides = array<i32>} : memref<1x4x1xf32, #tpu.memory_space<vmem>>, vector<1x4x1xf32>,
    } else {
    }
    return
  }
  func.func @transform_0(%arg0: i32, %arg1: i32, %arg2: i32) -> (i32, i32, i32) {
    %c0_i32 = arith.constant 0 : i32
    return %arg0, %arg1, %arg2 : i32, i32, i32
  }
  func.func @transform_1(%arg0: i32, %arg1: i32, %arg2: i32) -> (i32, i32, i32) {
    %c0_i32 = arith.constant 0 : i32
    %c0_i32_0 = arith.constant 0 : i32
    return %arg0, %arg1, %c0_i32 : i32, i32, i32
  }
}

</mosaic_0001>

<bundles_post_ra>
// kernel: tpu_custom_call.1
= control target key start
LH: loop header
LB: loop body
LE: loop exit
PB: predicated region body
PF: predicated region fallthrough
CT: control target
= control target key end

     0   :  { %6 = vsyncpa [#allocation4], 0  ;;  %s556_s0 = inlined_call_operand.hbm [shape: f32[2,4,256], index: 0, kind: input, shape index: {}]   ;;  %s557_s1 = inlined_call_operand.vmem [shape: f32[2,4,1], index: 1, kind: output, shape index: {}]  }
   0x1   :  { %8 = vsyncpa [#allocation4 + $0x1], 0  ;;  %s465_s6 = smov 0   ;;  %s467_s7 = smov 0  }
   0x2   :  { %s469_s8 = smov 0   ;;  %s471_s9 = smov 0  }
   0x3   :  { %s473_s10 = smov 0   ;;  %s475_s11 = smov 0  }
   0x4 LB: > { %s299_s12 = sadd.s32 4294967295, %s452_s11   ;;  %s33_s13 = sadd.s32 1, %s448_s10  ;;  %s452_s11 = sphi %s475_s11, %s14_s11   ;;  %s448_s10 = sphi %s473_s10, %s564_s10   ;;  %s444_s9 = sphi %s471_s9, %s563_s9   ;;  %s440_s8 = sphi %s469_s8, %s562_s8   ;;  %s436_s7 = sphi %s467_s7, %s561_s7   ;;  %s432_s6 = sphi %s465_s6, %s560_s6  }
   0x5   : > { %p35_p0 = scmp.ge.s32.totalorder %s33_s13, 2  ;;  %s44_s14 = sadd.s32 1, %s440_s8 }
   0x6   : > { %p51_p1 = scmp.ne.s32.totalorder %s440_s8, %s436_s7  ;;  %p52_p2 = scmp.eq.s32.totalorder %s452_s11, 0 }
   0x7   : > { %s566_s13 = smov (%p35_p0, %s33_s13), 0  ;;  %p57_p4 = scmp.ne.s32.totalorder %s436_s7, %s432_s6 }
   0x8   : > { %p501_p3 = por %p52_p2, %p51_p1  ;;  %s37_s16 = ssub.s32 %s448_s10, %s566_s13 }
   0x9   : > { %p58_p5 = scmp.eq.s32.totalorder %s299_s12, 0  ;;  %p42_p6 = scmp.eq.s32.totalorder %s37_s16, 0 }
   0xa   : > { %p318_p8 = scmp.lt.s32.totalorder %s452_s11, 2  ;;  %s109_s19 = sand.u32 1, %s440_s8  }
   0xb   : > { %p508_p7 = por %p58_p5, %p57_p4  ;;  %s311_s20 = sshll.u32 %s448_s10, 3 }
   0xc   : > { %s514_s18 = scalar_select %p42_p6, %s440_s8, %s44_s14  }
   0xd   : > { %s303_s21 = sshll.u32 %s109_s19, 3  ;;  %s122_s24 = scalar_lea.hbm %s556_s0, %s311_s20 }
   0xe   : > { %s124_s25 = sshll.u32 %s122_s24, 4  ;;  %s113_s26 = scalar_lea.vmem [#allocation3], %s303_s21  ;;  %s125_s25 = int_to_ptr.hbm [resolvable:$true] %s124_s25 }
   0xf   : > { %s126_s27 = sshll.u32 %s113_s26, 4  ;;  %p315_p9 = pnand %p318_p8, %p501_p3  ;;  %s127_s27 = int_to_ptr.vmem [resolvable:$true] %s126_s27 }
  0x10   : > { %p306_p10 = scmp.ge.s32.totalorder %s452_s11, 1  ;;  %p131_p11 = scmp.lt.s32.totalorder %s452_s11, 3 }
  0x11   : > { %s110_s28 = scalar_lea.sflag [#allocation4], %s109_s19 }
  0x12   : > { %317 = dma.hbm_to_vmem [thread:$0]  (!%p315_p9), %s125_s25, 128, %s127_s27, %s110_s28  }
  0x13   : > { %p132_p12 = pnand %p306_p10, %p131_p11 }
  0x14   : > { %s137_s29 = sand.u32 (!%p132_p12), 1, %s436_s7  }
  0x15   : > { %135 = sbr.rel (%p132_p12) target bundleno = 194 (0xc2), region = 24  ;;  %s307_s30 = sshll.u32 (!%p132_p12), %s137_s29, 3 }
  0x16   : > { %s138_s2 = scalar_lea.sflag (!%p132_p12), [#allocation4], %s137_s29  ;;  %s141_s3 = scalar_lea.vmem (!%p132_p12), [#allocation3], %s307_s30 }
  0x1a   : > { %427 = dma.done.wait (%p508_p7), %s138_s2, 128  }
  0x1b   : > { %429 = vsyncadd (%p508_p7), %s138_s2, 4294967168  ;;  %vm175_vm0 = vcmask 3072   ;;  %v454_v0 = vmov 0.0   ;;  %v177_v1 = vld [vmem:[%s141_s3] sm:$0xff]  ;;  %vm188_vm1 = vcmask 1043456   ;;  %p164_p13 = scmp.lt.s32.totalorder %s444_s9, 1 }
  0x1c   : > { %176 = vst.msk [vmem:[#allocation2] sm:$0xf] %vm175_vm0, %v454_v0  ;;  %v178_v2 = vmax.f32 %v177_v1, 1e-06 }
  0x1d   : > { %s568_s9 = smov (!%p164_p13, %s444_s9), 1 }
  0x1e   : > { %v179_v3 = vmul.f32 %v178_v2, %v178_v2  ;;  %s308_s4 = sshll.u32 %s568_s9, 2 }
  0x1f   : > { %s170_s12 = scalar_lea.vmem %s557_s1, %s308_s4 }
  0x20   : > { %v180_v4 = vmul.f32 %v179_v3, %v178_v2 }
  0x22   : > { %183 = vst [vmem:[#allocation1] ss:$2 sm:$0xff] %v180_v4 }
  0x23   : > { %v181_v10 = vld [vmem:[#allocation2] sm:$0xf] }
  0x29   : > { %v184_v5 = vld.sshfl [vmem:[#allocation1] sm:$0xff pattern:$0x75316420]  ;;  %v185_v6 = vld.sshfl [vmem:[#allocation1 + $0x8] sm:$0xff pattern:$0x75316420] }
  0x2a   : > { %v189_v7 = vsel %vm188_vm1, %v184_v5, 0.0  ;;  %v190_v8 = vsel %vm188_vm1, %v185_v6, 0.0 }
  0x2b   : > { %v191_v9 = vadd.f32 %v190_v8, %v189_v7 }
  0x2d   : > { %192 = vadd.xlane.f32.xlu0 %v191_v9 }
  0xa0   : > { %v193_v11 = vpop.xlane.xlu0 %192 }
  0xa1   : > { %v194_v12 = vadd.f32 %v193_v11, %v181_v10 }
  0xa3   : > { %196 = vst.msk [vmem:[#allocation2] sm:$0xf] %vm175_vm0, %v194_v12 }
  0xaa   : > { %v200_v13 = vld [vmem:[#allocation2] sm:$0xf] }
  0xab   : > { %v201_v14 = vmul.f32 0.00390625, %v200_v13 }
  0xad   : > { %368 = vlog2.f32 %v201_v14 }
  0xb3   : > { %v369_v15 = vpop.eup %368 }
  0xb4   : > { %v203_v16 = vmul.f32 0.6931472, %v369_v15 }
  0xb6   : > { %v204_v17 = vmul.f32 0.33333334, %v203_v16 }
  0xb8   : > { %v205_v18 = vmul.f32 1.442695, %v204_v17 }
  0xba   : > { %370 = vpow2.f32 %v205_v18 }
  0xc0   : > { %v371_v19 = vpop.eup %370 }
  0xc1   : > { %207 = vst.msk [vmem:[%s170_s12] sm:$0xf] %vm175_vm0, %v371_v19 }
  0xc2 PF: > { %s14_s11 = sadd.s32 1, %s452_s11   ;;  %s560_s6 = smov %s436_s7 }
  0xc3   : > { %p11_p0 = scmp.ge.s32.totalorder %s14_s11, 4   ;;  %s561_s7 = smov %s440_s8 }
  0xc4   : > { %s562_s8 = smov %s514_s18  ;;  %s563_s9 = smov %s448_s10 }
  0xc5   : > { %s564_s10 = smov %s566_s13  ;;  %13 = sbr.rel (!%p11_p0) target bundleno = 4 (0x4), region = 72 }
  0xca   :  { %233 = vsyncpa [#allocation4], 1 }
  0xcb   :  { %235 = vsyncpa [#allocation4 + $0x1], 1 }

</bundles_post_ra>
